<compile_context>
chip_gen: v6e
topology: v6e:2x2x1
jax: 0.10.0
libtpu: 0.0.40
codegen_flags: <defaults>
</compile_context>

<pallas_src>
import functools

import jax
import jax.numpy as jnp
from jax.experimental import pallas as pl
from jax.experimental.pallas import tpu as pltpu

EPS = 1e-4


def _layer_norm_kernel(x_ref, gamma_ref, beta_ref, o_ref, *, eps):
    """One (batch-rows, full-C, T-tile) block per grid step. Block: (bB, C, tT)."""
    x = x_ref[...].astype(jnp.float32)                    # (bB, C, tT), f32 math
    inv_c = jnp.float32(1.0 / x.shape[1])

    # Two-pass statistics over the channel (sublane) axis for numerical safety.
    mean = jnp.sum(x, axis=1, keepdims=True) * inv_c      # (bB, 1, tT)
    xc = x - mean
    var = jnp.sum(xc * xc, axis=1, keepdims=True) * inv_c  # (bB, 1, tT)
    inv = jax.lax.rsqrt(var + eps)                         # EUP slot (free vs VALU)

    g = gamma_ref[...].astype(jnp.float32)[None]           # (1, C, 1)
    b = beta_ref[...].astype(jnp.float32)[None]            # (1, C, 1)
    o_ref[...] = ((xc * inv) * g + b).astype(o_ref.dtype)


def _vmem_capacity_bytes(default=64 << 20):
    """Physical VMEM of the running chip; conservative v7x fallback."""
    try:
        info = pltpu.get_tpu_info()
    except Exception:
        return default
    for name in ("vmem_capacity_bytes", "vmem_size_bytes", "vmem_bytes"):
        val = getattr(info, name, None)
        if val:
            return int(val)
    return default


def _choose_tiles(B, C, T, itemsize, budget_bytes):
    """Pick (bB, tT) under a VMEM byte budget.

    Working set per block element ~= double-buffered in + out blocks at the
    input dtype plus ~3 f32 temporaries inside the kernel body.
    """
    per_elem = 4 * itemsize + 3 * 4
    col_bytes = C * per_elem                 # bytes per lane column (bB == 1)

    # Lane (T) tile: full T if small / it fits; otherwise the largest multiple
    # of 128 under the budget (edge tile handled by a cdiv grid).
    if T <= 128 or T * col_bytes <= budget_bytes:
        tT = T
    else:
        max_lanes = max(128, (budget_bytes // col_bytes) // 128 * 128)
        tT = int(min((T // 128) * 128, max_lanes))

    # Batch rows per block: grow while the block stays within budget (amortizes
    # per-grid-step overhead for tiny-C shapes).
    blk_bytes = C * tT * per_elem
    bB = int(max(1, min(B, budget_bytes // max(blk_bytes, 1))))

    # Keep >= 4 grid steps when there is real work so v7x's two TensorCores
    # both get fed by the "parallel" axes; irrelevant for tiny inputs.
    def steps(bB_, tT_):
        return -(-B // bB_) * -(-T // tT_)

    if B * C * T * itemsize > (8 << 20):
        while bB > 1 and steps(bB, tT) < 4:
            bB = max(1, bB // 2)
        while tT > 512 and tT % 256 == 0 and steps(bB, tT) < 4:
            tT //= 2
    return bB, tT


def layer_norm(x, gamma, beta, *, eps=EPS):
    """x: (B, C, *spatial...). Normalizes over dim 1. gamma/beta: (C,)."""
    orig_shape = x.shape
    assert x.ndim >= 2, "LayerNorm expects at least (B, C)"
    B, C = int(orig_shape[0]), int(orig_shape[1])
    T = 1
    for d in orig_shape[2:]:
        T *= int(d)
    T = max(T, 1)

    # Glue (no transposes): flatten trailing dims into one lane axis.
    # TODO(synk): for T << 128 with large B a one-time layout change that puts
    # a >=128 contiguous axis last would make the stores lane-dense; skipped
    # since long-sequence NCT (the rel_transformer case) is already dense.
    x3 = x.reshape(B, C, T)
    g2 = gamma.reshape(C, 1)
    b2 = beta.reshape(C, 1)

    itemsize = jnp.dtype(x.dtype).itemsize
    cap = _vmem_capacity_bytes()
    tile_budget = int(cap * 0.70)            # leave compiler/pipeline headroom
    bB, tT = _choose_tiles(B, C, T, itemsize, tile_budget)

    per_elem = 4 * itemsize + 3 * 4
    work_bytes = bB * C * tT * per_elem
    vmem_limit = int(min(int(cap * 0.90), max(4 << 20, work_bytes + (2 << 20))))

    grid = (pl.cdiv(B, bB), pl.cdiv(T, tT))

    kernel = functools.partial(_layer_norm_kernel, eps=eps)
    out = pl.pallas_call(
        kernel,
        out_shape=jax.ShapeDtypeStruct((B, C, T), x.dtype),
        grid_spec=pltpu.PrefetchScalarGridSpec(
            num_scalar_prefetch=0,
            grid=grid,
            in_specs=[
                pl.BlockSpec((bB, C, tT), lambda bi, ti: (bi, 0, ti)),
                pl.BlockSpec((C, 1), lambda bi, ti: (0, 0)),
                pl.BlockSpec((C, 1), lambda bi, ti: (0, 0)),
            ],
            out_specs=pl.BlockSpec((bB, C, tT), lambda bi, ti: (bi, 0, ti)),
        ),
        compiler_params=pltpu.CompilerParams(
            dimension_semantics=("parallel", "parallel"),
            vmem_limit_bytes=vmem_limit),
    )(x3, g2, b2)
    return out.reshape(orig_shape)


def reference(x, gamma, beta, *, eps=EPS):
    """Pure-JAX mirror of the PyTorch forward."""
    mean = jnp.mean(x, axis=1, keepdims=True)
    var = jnp.mean((x - mean) ** 2, axis=1, keepdims=True)
    y = (x - mean) * jax.lax.rsqrt(var + eps)
    shape = [1, -1] + [1] * (x.ndim - 2)
    return y * gamma.reshape(shape) + beta.reshape(shape)


if __name__ == "__main__":
    key = jax.random.PRNGKey(0)
    k1, k2, k3, k4 = jax.random.split(key, 4)

    # Primary case: NCT layout as used in rel_transformer.  B=2, C=4, T=16.
    B, C, T = 2, 4, 16
    x = jax.random.normal(k1, (B, C, T), jnp.float32)
    # Module inits gamma=1, beta=0; perturb so the affine path is exercised.
    gamma = 1.0 + 0.1 * jax.random.normal(k2, (C,), jnp.float32)
    beta = 0.1 * jax.random.normal(k3, (C,), jnp.float32)

    out = jax.block_until_ready(layer_norm(x, gamma, beta))
    ref = reference(x, gamma, beta)
    assert out.shape == x.shape
    assert jnp.allclose(out, ref, atol=1e-4, rtol=1e-4), (
        float(jnp.max(jnp.abs(out - ref))))

    # Generality check: 4-D input (B, C, H, W); trailing dims flatten to lanes.
    x4 = jax.random.normal(k4, (2, 4, 16, 16), jnp.float32)
    out4 = jax.block_until_ready(layer_norm(x4, gamma, beta))
    ref4 = reference(x4, gamma, beta)
    assert out4.shape == x4.shape
    assert jnp.allclose(out4, ref4, atol=1e-4, rtol=1e-4), (
        float(jnp.max(jnp.abs(out4 - ref4))))

    print("KERNEL_OK")
</pallas_src>

<mosaic_0001>
module attributes {stable_mosaic.version = 11 : i64} {
  func.func @_layer_norm_kernel(%arg0: i32, %arg1: i32, %arg2: memref<2x4x16xf32, #tpu.memory_space<vmem>>, %arg3: memref<4x1xf32, #tpu.memory_space<vmem>>, %arg4: memref<4x1xf32, #tpu.memory_space<vmem>>, %arg5: memref<2x4x16xf32, #tpu.memory_space<vmem>>) attributes {dimension_semantics = [#tpu.dimension_semantics<parallel>, #tpu.dimension_semantics<parallel>], iteration_bounds = array<i64: 1, 1>, scalar_prefetch = 0 : i64, scratch_operands = 0 : i64, tpu.core_type = #tpu.core_type<tc>, window_params = [{transform_indices = @transform_0, window_bounds = array<i64: 2, 4, 16>}, {pipeline_mode = #tpu.pipeline_mode<synchronous>, transform_indices = @transform_1, window_bounds = array<i64: 4, 1>}, {pipeline_mode = #tpu.pipeline_mode<synchronous>, transform_indices = @transform_2, window_bounds = array<i64: 4, 1>}, {transform_indices = @transform_3, window_bounds = array<i64: 2, 4, 16>}]} {
    %c0 = arith.constant 0 : index
    %c0_0 = arith.constant 0 : index
    %c0_1 = arith.constant 0 : index
    %0 = vector.load %arg2[%c0, %c0_0, %c0_1] : memref<2x4x16xf32, #tpu.memory_space<vmem>>, vector<2x4x16xf32>
    %cst = arith.constant dense<0.000000e+00> : vector<2x16xf32>
    %1 = vector.multi_reduction <add>, %0, %cst [1] : vector<2x4x16xf32> to vector<2x16xf32>
    %2 = vector.shape_cast %1 : vector<2x16xf32> to vector<2x1x16xf32>
    %cst_2 = arith.constant 2.500000e-01 : f32
    %3 = vector.broadcast %cst_2 : f32 to vector<2x1x16xf32>
    %4 = arith.mulf %2, %3 : vector<2x1x16xf32>
    %5 = vector.broadcast %4 : vector<2x1x16xf32> to vector<2x4x16xf32>
    %6 = arith.subf %0, %5 : vector<2x4x16xf32>
    %7 = arith.mulf %6, %6 : vector<2x4x16xf32>
    %cst_3 = arith.constant dense<0.000000e+00> : vector<2x16xf32>
    %8 = vector.multi_reduction <add>, %7, %cst_3 [1] : vector<2x4x16xf32> to vector<2x16xf32>
    %9 = vector.shape_cast %8 : vector<2x16xf32> to vector<2x1x16xf32>
    %cst_4 = arith.constant 2.500000e-01 : f32
    %10 = vector.broadcast %cst_4 : f32 to vector<2x1x16xf32>
    %11 = arith.mulf %9, %10 : vector<2x1x16xf32>
    %cst_5 = arith.constant 9.99999974E-5 : f32
    %12 = vector.broadcast %cst_5 : f32 to vector<2x1x16xf32>
    %13 = arith.addf %11, %12 : vector<2x1x16xf32>
    %14 = math.rsqrt %13 : vector<2x1x16xf32>
    %c0_6 = arith.constant 0 : index
    %c0_7 = arith.constant 0 : index
    %15 = vector.load %arg3[%c0_6, %c0_7] : memref<4x1xf32, #tpu.memory_space<vmem>>, vector<4x1xf32>
    %16 = vector.shape_cast %15 : vector<4x1xf32> to vector<1x4x1xf32>
    %c0_8 = arith.constant 0 : index
    %c0_9 = arith.constant 0 : index
    %17 = vector.load %arg4[%c0_8, %c0_9] : memref<4x1xf32, #tpu.memory_space<vmem>>, vector<4x1xf32>
    %18 = vector.shape_cast %17 : vector<4x1xf32> to vector<1x4x1xf32>
    %19 = vector.broadcast %14 : vector<2x1x16xf32> to vector<2x4x16xf32>
    %20 = arith.mulf %6, %19 : vector<2x4x16xf32>
    %21 = vector.broadcast %16 : vector<1x4x1xf32> to vector<2x4x16xf32>
    %22 = arith.mulf %20, %21 : vector<2x4x16xf32>
    %23 = vector.broadcast %18 : vector<1x4x1xf32> to vector<2x4x16xf32>
    %24 = arith.addf %22, %23 : vector<2x4x16xf32>
    %c0_10 = arith.constant 0 : index
    %c0_11 = arith.constant 0 : index
    %c0_12 = arith.constant 0 : index
    %25 = vector.load %arg5[%c0_10, %c0_11, %c0_12] : memref<2x4x16xf32, #tpu.memory_space<vmem>>, vector<2x4x16xf32>
    tpu.vector_store %arg5[%c0_10, %c0_11, %c0_12], %24 {strides = array<i32>} : memref<2x4x16xf32, #tpu.memory_space<vmem>>, vector<2x4x16xf32>,
    return
  }
  func.func @transform_0(%arg0: i32, %arg1: i32) -> (i32, i32, i32) {
    %c0_i32 = arith.constant 0 : i32
    %c0_i32_0 = arith.constant 0 : i32
    return %arg0, %c0_i32, %arg1 : i32, i32, i32
  }
  func.func @transform_1(%arg0: i32, %arg1: i32) -> (i32, i32) {
    %c0_i32 = arith.constant 0 : i32
    %c0_i32_0 = arith.constant 0 : i32
    %c0_i32_1 = arith.constant 0 : i32
    return %c0_i32, %c0_i32_0 : i32, i32
  }
  func.func @transform_2(%arg0: i32, %arg1: i32) -> (i32, i32) {
    %c0_i32 = arith.constant 0 : i32
    %c0_i32_0 = arith.constant 0 : i32
    %c0_i32_1 = arith.constant 0 : i32
    return %c0_i32, %c0_i32_0 : i32, i32
  }
  func.func @transform_3(%arg0: i32, %arg1: i32) -> (i32, i32, i32) {
    %c0_i32 = arith.constant 0 : i32
    %c0_i32_0 = arith.constant 0 : i32
    return %arg0, %c0_i32, %arg1 : i32, i32, i32
  }
}

</mosaic_0001>

<bundles_post_ra>
// kernel: tpu_custom_call.1
= control target key start
LH: loop header
LB: loop body
LE: loop exit
PB: predicated region body
PF: predicated region fallthrough
CT: control target
= control target key end

     0   :  { %v125_v1 = vmov 0   ;;  %s170_s0 = inlined_call_operand.vmem [shape: f32[2,4,16], index: 0, kind: input, shape index: {}]   ;;  %s171_s1 = inlined_call_operand.vmem [shape: f32[4,1], index: 1, kind: input, shape index: {}]   ;;  %s172_s2 = inlined_call_operand.vmem [shape: f32[4,1], index: 2, kind: input, shape index: {}]   ;;  %s173_s3 = inlined_call_operand.hbm [shape: f32[2,4,16], index: 3, kind: output, shape index: {}]  }
   0x1   :  { %v58_v0 = vld [vmem:[%s171_s1] sm:$0xf]  ;;  %98 = vset.pattern.permute.xlu0 %v125_v1 }
   0x2   :  { %8 = vsyncpa [#allocation3], 0  ;;  %64 = vperm.xlu0 %98, %v58_v0   ;;  %v59_v2 = vld [vmem:[%s172_s2] sm:$0xf]  ;;  %vm17_vm0 = vcmask 125952  }
   0x3   :  { %v15_v3 = vld [vmem:[%s170_s0] sm:$0xf]  ;;  %v16_v4 = vld [vmem:[%s170_s0 + $0x4] sm:$0xf]  ;;  %s126_s0 = smov [#allocation2]  }
   0x4   :  { %v18_v5 = vsel %vm17_vm0, %v15_v3, 0.0  ;;  %v25_v6 = vsel %vm17_vm0, %v16_v4, 0.0  ;;  %s83_s1 = sshll.u32 %s126_s0, 4  ;;  %s84_s1 = int_to_ptr.vmem [resolvable:$true] %s83_s1 }
   0x5   :  { %v19_v7 = vrot.slane %v18_v5, 4  ;;  %v26_v8 = vrot.slane %v25_v6, 4  ;;  %s103_s2 = scalar_lea.vmem %s84_s1, 128  ;;  %p108_p1 = scmp.lt.s32.totalorder %s84_s1, %s84_s1 }
   0x6   :  { %71 = vperm.xlu0 %98, %v59_v2   ;;  %p104_p0 = scmp.ne.s32.totalorder %s84_s1, %s103_s2  ;;  %p109_p2 = scmp.lt.s32.totalorder %s103_s2, %s103_s2 }
   0x7   :  { %v20_v9 = vadd.f32 %v19_v7, %v18_v5  ;;  %v27_v10 = vadd.f32 %v26_v8, %v25_v6 }
   0x8   :  { %p110_p3 = por %p109_p2, %p108_p1 }
   0x9   :  { %v21_v11 = vrot.slane %v20_v9, 2  ;;  %v28_v12 = vrot.slane %v27_v10, 2 }
   0xa   :  { %p111_p4 = pnand %p110_p3, %p104_p0 }
   0xb   :  { %v22_v13 = vadd.f32 %v21_v11, %v20_v9  ;;  %v29_v14 = vadd.f32 %v28_v12, %v27_v10 }
   0xd   :  { %v23_v15 = vrot.slane %v22_v13, 1  ;;  %v30_v16 = vrot.slane %v29_v14, 1 }
   0xf   :  { %v24_v17 = vadd.f32 %v23_v15, %v22_v13  ;;  %v31_v18 = vadd.f32 %v30_v16, %v29_v14 }
  0x11   :  { %v32_v19 = vmul.f32 0.25, %v24_v17  ;;  %v33_v20 = vmul.f32 0.25, %v31_v18 }
  0x13   :  { %v34_v21 = vsub.f32 %v15_v3, %v32_v19  ;;  %v35_v22 = vsub.f32 %v16_v4, %v33_v20 }
  0x15   :  { %v36_v23 = vmul.f32 %v34_v21, %v34_v21  ;;  %v37_v24 = vmul.f32 %v35_v22, %v35_v22 }
  0x17   :  { %v38_v25 = vsel %vm17_vm0, %v36_v23, 0.0  ;;  %v45_v26 = vsel %vm17_vm0, %v37_v24, 0.0 }
  0x18   :  { %v39_v27 = vrot.slane %v38_v25, 4  ;;  %v46_v28 = vrot.slane %v45_v26, 4 }
  0x1a   :  { %v40_v29 = vadd.f32 %v39_v27, %v38_v25  ;;  %v47_v30 = vadd.f32 %v46_v28, %v45_v26 }
  0x1c   :  { %v41_v31 = vrot.slane %v40_v29, 2  ;;  %v48_v32 = vrot.slane %v47_v30, 2 }
  0x1e   :  { %v42_v33 = vadd.f32 %v41_v31, %v40_v29  ;;  %v49_v34 = vadd.f32 %v48_v32, %v47_v30 }
  0x20   :  { %v43_v35 = vrot.slane %v42_v33, 1  ;;  %v50_v36 = vrot.slane %v49_v34, 1 }
  0x22   :  { %v44_v37 = vadd.f32 %v43_v35, %v42_v33  ;;  %v51_v38 = vadd.f32 %v50_v36, %v49_v34 }
  0x24   :  { %v52_v39 = vmul.f32 0.25, %v44_v37  ;;  %v53_v40 = vmul.f32 0.25, %v51_v38 }
  0x26   :  { %v54_v41 = vadd.f32 0.0001, %v52_v39  ;;  %v55_v42 = vadd.f32 0.0001, %v53_v40 }
  0x28   :  { %99 = vrsqrt.f32 %v54_v41 }
  0x29   :  { %101 = vrsqrt.f32 %v55_v42 }
  0x35   :  { %v100_v43 = vpop.eup %99 }
  0x36   :  { %v102_v44 = vpop.eup %101  ;;  %v60_v45 = vmul.f32 %v100_v43, %v34_v21 }
  0x37   :  { %v61_v46 = vmul.f32 %v102_v44, %v35_v22 }
  0x7d   :  { %v65_v47 = vpop.permute.xlu0 %64 }
  0x7e   :  { %v67_v48 = vmul.f32 %v65_v47, %v60_v45  ;;  %v68_v49 = vmul.f32 %v65_v47, %v61_v46 }
  0x81   :  { %v72_v50 = vpop.permute.xlu0 %71 }
  0x82   :  { %v74_v51 = vadd.f32 %v72_v50, %v67_v48  ;;  %v75_v52 = vadd.f32 %v72_v50, %v68_v49 }
  0x84   :  { %76 = vst.msk [vmem:[#allocation2] sm:$0xf] %vm17_vm0, %v74_v51  ;;  %77 = vst.msk [vmem:[#allocation2 + $0x4] sm:$0xf] %vm17_vm0, %v75_v52 }
  0x85   :  { %114 = shalt.err (!%p111_p4)
}
  0x86   :  { %s127_s20 = smov 64   ;;  %s128_s21 = smov 4  }
  0x87   :  { %89 = dma.vmem_to_hbm [thread:$0]  %s84_s1, 128, %s173_s3, [#allocation3], %s127_s20, %s127_s20, %s128_s21  }
  0x88   :  { %123 = dma.done.wait [#allocation3], 128  }
  0x89   :  { %124 = vsyncadd [#allocation3], 4294967168 }
  0x8a   :  { %93 = vsyncpa [#allocation3], 1 }

</bundles_post_ra>
